<compile_context>
chip_gen: v6e
topology: v6e:2x2x1
jax: 0.10.0
libtpu: 0.0.40
codegen_flags: <defaults>
</compile_context>

<pallas_src>
import jax
import jax.numpy as jnp
from jax import lax
from jax.experimental import pallas as pl
from jax.experimental.pallas import tpu as pltpu

EPS = 1e-5


def _make_postnorm_kernel(segmented: bool):
    """segmented=True: each physical row holds `fold` logical rows; LayerNorm stats
    are computed with a segment-averaging matmul (stays lane-dense, MXU has slack in
    this mem-bound kernel). segmented=False: plain last-axis reductions."""

    def kernel(x_ref, wt_ref, avg_ref, p_ref, o_ref):
        x = x_ref[...]
        x_f32 = x.astype(jnp.float32)          # residual / LayerNorm path (f32)
        x_mm = x.astype(wt_ref.dtype)          # MXU operand dtype (bf16 or f32)

        p = p_ref[...].astype(jnp.float32)     # (3, Df): [bias; gamma; beta]
        bias, gamma, beta = p[0], p[1], p[2]

        # fn(x): Linear.  Weight is pre-transposed (and block-diagonal when folded)
        # in the wrapper, so the MXU sees a canonical [K, N] rhs; accumulate in f32.
        h = jnp.dot(x_mm, wt_ref[...], preferred_element_type=jnp.float32)
        s = h + bias + x_f32                   # residual add (f32)

        if segmented:
            # avg[i, j] = 1/D iff lanes i and j belong to the same logical row, so
            # s @ avg broadcasts each segment's mean to all of that segment's lanes
            # and the whole LayerNorm stays in the lane-dense (tm, fold*D) layout.
            avg = avg_ref[...]
            mean = jnp.dot(s, avg, preferred_element_type=jnp.float32)
            c = s - mean
            var = jnp.dot(c * c, avg, preferred_element_type=jnp.float32)
        else:
            mean = jnp.mean(s, axis=-1, keepdims=True)
            c = s - mean
            var = jnp.mean(c * c, axis=-1, keepdims=True)

        o_ref[...] = (c * lax.rsqrt(var + EPS) * gamma + beta).astype(o_ref.dtype)

    return kernel


def postnorm_linear(x, w, b, gamma, beta, *, tm=2048,
                    matmul_dtype=jnp.bfloat16, out_dtype=None):
    """x: [B, S, D]; w: [D, D] (PyTorch Linear layout [out, in]); b/gamma/beta: [D].
    Returns LayerNorm(x @ w.T + b + x) with eps=1e-5."""
    B, S, D = x.shape
    M = B * S
    out_dtype = x.dtype if out_dtype is None else out_dtype

    # Lane-dense folding: pack `fold` consecutive logical rows (width D) into one
    # physical row of width fold*D (target 128 lanes) whenever D < 128.
    fold = 1
    if D < 128 and 128 % D == 0:
        fold = 128 // D
        while fold > 1 and M % fold != 0:
            fold //= 2
    Mf, Df = M // fold, fold * D

    # Contiguous row-major reshape: free (no extra HBM copy).
    x2 = x.reshape(Mf, Df)

    # Row tile: a single full-extent block for small inputs, otherwise a large
    # 8-aligned tile.  A partial boundary block (Mf % tm != 0) is masked by Pallas,
    # so no wrapper-side padding or output slicing is needed.
    tm = int(tm)
    if Mf <= tm:
        tm = Mf
    else:
        tm = max(8, (tm // 8) * 8)
    grid_rows = pl.cdiv(Mf, tm)

    # One-time (trace-time) parameter prep, outside the kernel.
    wt = jnp.kron(jnp.eye(fold, dtype=jnp.float32),
                  w.T.astype(jnp.float32)).astype(matmul_dtype)       # (Df, Df)
    avg = jnp.kron(jnp.eye(fold, dtype=jnp.float32),
                   jnp.full((D, D), 1.0 / D, dtype=jnp.float32))      # (Df, Df) f32
    params = jnp.stack([jnp.tile(b.astype(jnp.float32), fold),
                        jnp.tile(gamma.astype(jnp.float32), fold),
                        jnp.tile(beta.astype(jnp.float32), fold)])    # (3, Df)

    # Scoped VMEM budget: double-buffered x/out tiles + grid-invariant weight,
    # averaging matrix and params, plus slack; capped below v7x's 64 MiB physical VMEM.
    vmem_bytes = (2 * tm * Df * x2.dtype.itemsize
                  + 2 * tm * Df * jnp.dtype(out_dtype).itemsize
                  + 2 * Df * Df * jnp.dtype(matmul_dtype).itemsize
                  + 2 * Df * Df * 4
                  + 2 * 3 * Df * 4
                  + (4 << 20))
    vmem_limit = int(min(48 << 20, max(16 << 20, vmem_bytes)))

    out = pl.pallas_call(
        _make_postnorm_kernel(segmented=fold > 1),
        out_shape=jax.ShapeDtypeStruct((Mf, Df), out_dtype),
        grid_spec=pltpu.PrefetchScalarGridSpec(
            num_scalar_prefetch=0,
            grid=(grid_rows,),
            in_specs=[
                pl.BlockSpec((tm, Df), lambda i: (i, 0)),   # folded x rows
                pl.BlockSpec((Df, Df), lambda i: (0, 0)),   # block-diag W.T (pre-transposed)
                pl.BlockSpec((Df, Df), lambda i: (0, 0)),   # segment-averaging matrix
                pl.BlockSpec((3, Df), lambda i: (0, 0)),    # [bias; gamma; beta]
            ],
            out_specs=pl.BlockSpec((tm, Df), lambda i: (i, 0)),
        ),
        compiler_params=pltpu.CompilerParams(
            dimension_semantics=("parallel",),
            vmem_limit_bytes=vmem_limit,
        ),
    )(x2, wt, avg, params)

    return out.reshape(B, S, D)


def reference(x, w, b, gamma, beta):
    h = jnp.einsum("bsd,od->bso", x, w, precision=lax.Precision.HIGHEST) + b
    s = h + x
    mean = jnp.mean(s, axis=-1, keepdims=True)
    var = jnp.mean((s - mean) ** 2, axis=-1, keepdims=True)
    return (s - mean) / jnp.sqrt(var + EPS) * gamma + beta


if __name__ == "__main__":
    key = jax.random.PRNGKey(0)
    B, S, D = 2, 8, 32

    kx, kw, kb = jax.random.split(key, 3)
    x = jax.random.normal(kx, (B, S, D), dtype=jnp.float32)

    # Deterministic synthetic parameters (PostNorm(dim, fn=Linear(dim, dim))).
    w = jax.random.normal(kw, (D, D), dtype=jnp.float32) * 0.05   # Linear weight (out, in)
    b = jax.random.normal(kb, (D,), dtype=jnp.float32) * 0.01     # Linear bias
    gamma = jnp.ones((D,), dtype=jnp.float32)                     # LayerNorm weight
    beta = jnp.zeros((D,), dtype=jnp.float32)                     # LayerNorm bias

    y_ref = reference(x, w, b, gamma, beta)

    # 1) f32 MXU path (lane-dense fold=4 layout).
    y32 = postnorm_linear(x, w, b, gamma, beta, matmul_dtype=jnp.float32)
    jax.block_until_ready(y32)
    assert y32.shape == x.shape
    assert jnp.allclose(y32, y_ref, atol=1e-3, rtol=1e-3), "f32 path mismatch"

    # 2) Fast path: bf16 MXU operands, f32 accumulation + f32 LayerNorm.
    ybf = postnorm_linear(x, w, b, gamma, beta)
    jax.block_until_ready(ybf)
    assert jnp.allclose(ybf, y_ref, atol=2e-2, rtol=2e-2), "bf16 path mismatch"

    # 3) Ragged row count (M=10): fold falls back to 2, no wrapper-side padding.
    x_tail = x[:, :5, :]
    y_tail = postnorm_linear(x_tail, w, b, gamma, beta, matmul_dtype=jnp.float32)
    jax.block_until_ready(y_tail)
    assert jnp.allclose(y_tail, reference(x_tail, w, b, gamma, beta),
                        atol=1e-3, rtol=1e-3), "ragged-M mismatch"

    # 4) Multi-step grid with a masked boundary block (Mf=18, tm=8 -> grid 3).
    x_big = jax.random.normal(jax.random.PRNGKey(1), (2, 36, D), dtype=jnp.float32)
    y_big = postnorm_linear(x_big, w, b, gamma, beta, tm=8, matmul_dtype=jnp.float32)
    jax.block_until_ready(y_big)
    assert jnp.allclose(y_big, reference(x_big, w, b, gamma, beta),
                        atol=1e-3, rtol=1e-3), "boundary-block mismatch"

    # 5) D=128 (no fold): plain last-axis LayerNorm reductions.
    D2 = 128
    k1, k2, k3 = jax.random.split(jax.random.PRNGKey(2), 3)
    x128 = jax.random.normal(k1, (2, 4, D2), dtype=jnp.float32)
    w128 = jax.random.normal(k2, (D2, D2), dtype=jnp.float32) * 0.03
    b128 = jax.random.normal(k3, (D2,), dtype=jnp.float32) * 0.01
    g128 = jnp.ones((D2,), dtype=jnp.float32)
    be128 = jnp.zeros((D2,), dtype=jnp.float32)
    y128 = postnorm_linear(x128, w128, b128, g128, be128, matmul_dtype=jnp.float32)
    jax.block_until_ready(y128)
    assert jnp.allclose(y128, reference(x128, w128, b128, g128, be128),
                        atol=1e-3, rtol=1e-3), "D=128 path mismatch"

    print("KERNEL_OK")
</pallas_src>

<mosaic_0001>
module attributes {stable_mosaic.version = 11 : i64} {
  func.func @kernel(%arg0: i32, %arg1: memref<4x128xf32, #tpu.memory_space<vmem>>, %arg2: memref<128x128xf32, #tpu.memory_space<vmem>>, %arg3: memref<128x128xf32, #tpu.memory_space<vmem>>, %arg4: memref<3x128xf32, #tpu.memory_space<vmem>>, %arg5: memref<4x128xf32, #tpu.memory_space<vmem>>) attributes {dimension_semantics = [#tpu.dimension_semantics<parallel>], iteration_bounds = array<i64: 1>, scalar_prefetch = 0 : i64, scratch_operands = 0 : i64, tpu.core_type = #tpu.core_type<tc>, window_params = [{transform_indices = @transform_0, window_bounds = array<i64: 4, 128>}, {pipeline_mode = #tpu.pipeline_mode<synchronous>, transform_indices = @transform_1, window_bounds = array<i64: 128, 128>}, {pipeline_mode = #tpu.pipeline_mode<synchronous>, transform_indices = @transform_2, window_bounds = array<i64: 128, 128>}, {pipeline_mode = #tpu.pipeline_mode<synchronous>, transform_indices = @transform_3, window_bounds = array<i64: 3, 128>}, {transform_indices = @transform_4, window_bounds = array<i64: 4, 128>}]} {
    %c0 = arith.constant 0 : index
    %c0_0 = arith.constant 0 : index
    %0 = vector.load %arg1[%c0, %c0_0] : memref<4x128xf32, #tpu.memory_space<vmem>>, vector<4x128xf32>
    %c0_1 = arith.constant 0 : index
    %c0_2 = arith.constant 0 : index
    %1 = vector.load %arg4[%c0_1, %c0_2] : memref<3x128xf32, #tpu.memory_space<vmem>>, vector<3x128xf32>
    %2 = vector.extract_strided_slice %1 {offsets = [0, 0], sizes = [1, 128], strides = [1, 1]} : vector<3x128xf32> to vector<1x128xf32>
    %3 = vector.shape_cast %2 : vector<1x128xf32> to vector<128xf32>
    %4 = vector.extract_strided_slice %1 {offsets = [1, 0], sizes = [1, 128], strides = [1, 1]} : vector<3x128xf32> to vector<1x128xf32>
    %5 = vector.shape_cast %4 : vector<1x128xf32> to vector<128xf32>
    %6 = vector.extract_strided_slice %1 {offsets = [2, 0], sizes = [1, 128], strides = [1, 1]} : vector<3x128xf32> to vector<1x128xf32>
    %7 = vector.shape_cast %6 : vector<1x128xf32> to vector<128xf32>
    %c0_3 = arith.constant 0 : index
    %c0_4 = arith.constant 0 : index
    %8 = vector.load %arg2[%c0_3, %c0_4] : memref<128x128xf32, #tpu.memory_space<vmem>>, vector<128x128xf32>
    %cst = arith.constant dense<0.000000e+00> : vector<4x128xf32>
    %9 = tpu.matmul %0, %8, %cst {dimension_numbers = #tpu.dot_dimension_numbers<[1], [0], [0], [1], [0, 0, 1, 1], [], []>} : vector<4x128xf32>, vector<128x128xf32>, vector<4x128xf32> -> vector<4x128xf32>
    %10 = vector.shape_cast %3 : vector<128xf32> to vector<1x128xf32>
    %11 = vector.broadcast %10 : vector<1x128xf32> to vector<4x128xf32>
    %12 = arith.addf %9, %11 : vector<4x128xf32>
    %13 = arith.addf %12, %0 : vector<4x128xf32>
    %c0_5 = arith.constant 0 : index
    %c0_6 = arith.constant 0 : index
    %14 = vector.load %arg3[%c0_5, %c0_6] : memref<128x128xf32, #tpu.memory_space<vmem>>, vector<128x128xf32>
    %cst_7 = arith.constant dense<0.000000e+00> : vector<4x128xf32>
    %15 = tpu.matmul %13, %14, %cst_7 {dimension_numbers = #tpu.dot_dimension_numbers<[1], [0], [0], [1], [0, 0, 1, 1], [], []>} : vector<4x128xf32>, vector<128x128xf32>, vector<4x128xf32> -> vector<4x128xf32>
    %16 = arith.subf %13, %15 : vector<4x128xf32>
    %17 = arith.mulf %16, %16 : vector<4x128xf32>
    %cst_8 = arith.constant dense<0.000000e+00> : vector<4x128xf32>
    %18 = tpu.matmul %17, %14, %cst_8 {dimension_numbers = #tpu.dot_dimension_numbers<[1], [0], [0], [1], [0, 0, 1, 1], [], []>} : vector<4x128xf32>, vector<128x128xf32>, vector<4x128xf32> -> vector<4x128xf32>
    %cst_9 = arith.constant 9.99999974E-6 : f32
    %19 = vector.broadcast %cst_9 : f32 to vector<4x128xf32>
    %20 = arith.addf %18, %19 : vector<4x128xf32>
    %21 = math.rsqrt %20 : vector<4x128xf32>
    %22 = arith.mulf %16, %21 : vector<4x128xf32>
    %23 = vector.shape_cast %5 : vector<128xf32> to vector<1x128xf32>
    %24 = vector.broadcast %23 : vector<1x128xf32> to vector<4x128xf32>
    %25 = arith.mulf %22, %24 : vector<4x128xf32>
    %26 = vector.shape_cast %7 : vector<128xf32> to vector<1x128xf32>
    %27 = vector.broadcast %26 : vector<1x128xf32> to vector<4x128xf32>
    %28 = arith.addf %25, %27 : vector<4x128xf32>
    %c0_10 = arith.constant 0 : index
    %c0_11 = arith.constant 0 : index
    %29 = vector.load %arg5[%c0_10, %c0_11] : memref<4x128xf32, #tpu.memory_space<vmem>>, vector<4x128xf32>
    tpu.vector_store %arg5[%c0_10, %c0_11], %28 {strides = array<i32>} : memref<4x128xf32, #tpu.memory_space<vmem>>, vector<4x128xf32>,
    return
  }
  func.func @transform_0(%arg0: i32) -> (i32, i32) {
    %c0_i32 = arith.constant 0 : i32
    %c0_i32_0 = arith.constant 0 : i32
    return %arg0, %c0_i32 : i32, i32
  }
  func.func @transform_1(%arg0: i32) -> (i32, i32) {
    %c0_i32 = arith.constant 0 : i32
    %c0_i32_0 = arith.constant 0 : i32
    %c0_i32_1 = arith.constant 0 : i32
    return %c0_i32, %c0_i32_0 : i32, i32
  }
  func.func @transform_2(%arg0: i32) -> (i32, i32) {
    %c0_i32 = arith.constant 0 : i32
    %c0_i32_0 = arith.constant 0 : i32
    %c0_i32_1 = arith.constant 0 : i32
    return %c0_i32, %c0_i32_0 : i32, i32
  }
  func.func @transform_3(%arg0: i32) -> (i32, i32) {
    %c0_i32 = arith.constant 0 : i32
    %c0_i32_0 = arith.constant 0 : i32
    %c0_i32_1 = arith.constant 0 : i32
    return %c0_i32, %c0_i32_0 : i32, i32
  }
  func.func @transform_4(%arg0: i32) -> (i32, i32) {
    %c0_i32 = arith.constant 0 : i32
    %c0_i32_0 = arith.constant 0 : i32
    return %arg0, %c0_i32 : i32, i32
  }
}

</mosaic_0001>

<bundles_post_ra>
// kernel: tpu_custom_call.1
= control target key start
LH: loop header
LB: loop body
LE: loop exit
PB: predicated region body
PF: predicated region fallthrough
CT: control target
= control target key end

     0   :  { %9 = vsyncpa [#allocation3], 0  ;;  %s715_s0 = inlined_call_operand.hbm [shape: f32[4,128], index: 0, kind: input, shape index: {}]   ;;  %s716_s1 = inlined_call_operand.hbm [shape: f32[128,128], index: 1, kind: input, shape index: {}]   ;;  %s717_s2 = inlined_call_operand.hbm [shape: f32[128,128], index: 2, kind: input, shape index: {}]   ;;  %s718_s3 = inlined_call_operand.vmem [shape: f32[3,128], index: 3, kind: input, shape index: {}]   ;;  %s719_s4 = inlined_call_operand.hbm [shape: f32[4,128], index: 4, kind: output, shape index: {}]  }
   0x1   :  { %10 = vsyncpa [#allocation6], 0 }
   0x2   :  { %11 = vsyncpa [#allocation4], 0  ;;  %s589_s15 = smov [#allocation5]  }
   0x3   :  { %s27_s16 = sshll.u32 %s589_s15, 4  ;;  %s28_s16 = int_to_ptr.vmem [resolvable:$true] %s27_s16 }
   0x4   :  { %s511_s17 = scalar_lea.vmem %s28_s16, 2048  ;;  %p516_p1 = scmp.lt.s32.totalorder %s28_s16, %s28_s16 }
   0x5   :  { %p512_p0 = scmp.ne.s32.totalorder %s28_s16, %s511_s17  ;;  %p517_p2 = scmp.lt.s32.totalorder %s511_s17, %s511_s17 }
   0x7   :  { %p518_p3 = por %p517_p2, %p516_p1 }
   0x9   :  { %p519_p4 = pnand %p518_p3, %p512_p0 }
   0xb   :  { %522 = shalt.err (!%p519_p4)
}
   0xc   :  { %s590_s18 = smov 128   ;;  %s591_s19 = smov 8  }
   0xd   :  { %33 = dma.hbm_to_vmem [thread:$0]  %s716_s1, 2048, %s28_s16, [#allocation6], %s590_s18, %s590_s18, %s591_s19  }
   0xe   :  { %s592_s22 = smov [#allocation2]   ;;  %s593_s24 = smov [#allocation7]  }
   0xf   :  { %s18_s23 = sshll.u32 %s592_s22, 4  ;;  %s39_s25 = sshll.u32 %s593_s24, 4  ;;  %s19_s23 = int_to_ptr.vmem [resolvable:$true] %s18_s23  ;;  %s40_s25 = int_to_ptr.vmem [resolvable:$true] %s39_s25 }
  0x10   :  { %s531_s26 = scalar_lea.vmem %s19_s23, 64  ;;  %p536_p6 = scmp.lt.s32.totalorder %s19_s23, %s19_s23 }
  0x11   :  { %p532_p5 = scmp.ne.s32.totalorder %s19_s23, %s531_s26  ;;  %p537_p7 = scmp.lt.s32.totalorder %s531_s26, %s531_s26 }
  0x13   :  { %p538_p8 = por %p537_p7, %p536_p6 }
  0x15   :  { %p539_p9 = pnand %p538_p8, %p532_p5 }
  0x17   :  { %542 = shalt.err (!%p539_p9)
}
  0x18   :  { %21 = dma.hbm_to_vmem [thread:$0]  %s715_s0, 64, %s19_s23, [#allocation3]  }
  0x19   :  { %s551_s29 = scalar_lea.vmem %s40_s25, 2048  ;;  %p556_p11 = scmp.lt.s32.totalorder %s40_s25, %s40_s25 }
  0x1a   :  { %p552_p10 = scmp.ne.s32.totalorder %s40_s25, %s551_s29  ;;  %p557_p12 = scmp.lt.s32.totalorder %s551_s29, %s551_s29 }
  0x1c   :  { %p558_p13 = por %p557_p12, %p556_p11 }
  0x1e   :  { %p559_p0 = pnand %p558_p13, %p552_p10 }
  0x20   :  { %562 = shalt.err (!%p559_p0)
}
  0x21   :  { %45 = dma.hbm_to_vmem [thread:$0]  %s717_s2, 2048, %s40_s25, [#allocation6], %s590_s18, %s590_s18, %s591_s19  }
  0x22   :  { %583 = dma.done.wait [#allocation3], 64  }
  0x23   :  { %584 = vsyncadd [#allocation3], 4294967232 }
  0x24   :  { %585 = dma.done.wait [#allocation6], 4096  }
  0x25   :  { %586 = vsyncadd [#allocation6], 4294963200  ;;  %v594_v0 = vmov 0.0   ;;  %vm595_vm0 = vmmov 0   ;;  %v74_v1 = vld [vmem:[#allocation5 + $0x78] sm:$0xff]  ;;  %v73_v2 = vld [vmem:[#allocation5 + $0x70] sm:$0xff]  ;;  %v75_v34 = vlaneseq }
  0x26   :  { %388 = vmatprep.subr.mxu0 %v594_v0  ;;  %420 = vmatprep.mubr.msk.f32.mxu0 %vm595_vm0, %v594_v0  ;;  %v72_v3 = vld [vmem:[#allocation5 + $0x68] sm:$0xff]  ;;  %v71_v4 = vld [vmem:[#allocation5 + $0x60] sm:$0xff]  ;;  %v639_v5 = vld [vmem:[#allocation7 + $0x78] sm:$0xff] }
  0x27   :  { %423 = vmatprep.subr.mxu1 %v594_v0  ;;  %455 = vmatprep.mubr.msk.f32.mxu1 %vm595_vm0, %v594_v0  ;;  %v70_v6 = vld [vmem:[#allocation5 + $0x58] sm:$0xff]  ;;  %v643_v7 = vld [vmem:[#allocation7 + $0x70] sm:$0xff]  ;;  %v646_v8 = vld [vmem:[#allocation7 + $0x68] sm:$0xff]  ;;  %v76_v35 = vshrl.u32 %v75_v34, 7 }
  0x28   :  { %389 = vmatpush3.msra.mxu0 %v74_v1  ;;  %424 = vmatpush3.msra.mxu1 %v639_v5  ;;  %v69_v9 = vld [vmem:[#allocation5 + $0x50] sm:$0xff]  ;;  %v651_v10 = vld [vmem:[#allocation7 + $0x60] sm:$0xff]  ;;  %v68_v11 = vld [vmem:[#allocation5 + $0x48] sm:$0xff] }
  0x29   :  { %390 = vmatprep.subr.mxu0 %v594_v0  ;;  %425 = vmatprep.subr.mxu1 %v594_v0  ;;  %v656_v12 = vld [vmem:[#allocation7 + $0x58] sm:$0xff]  ;;  %v67_v13 = vld [vmem:[#allocation5 + $0x40] sm:$0xff]  ;;  %v661_v14 = vld [vmem:[#allocation7 + $0x50] sm:$0xff]  ;;  %v77_v36 = vsub.s32 0, %v76_v35  ;;  %v312_v50 = vsub.s32 1, %v76_v35  ;;  %v317_v51 = vsub.s32 2, %v76_v35 }
  0x2a   :  { %391 = vmatpush3.msra.mxu0 %v73_v2  ;;  %426 = vmatpush3.msra.mxu1 %v643_v7  ;;  %v66_v15 = vld [vmem:[#allocation5 + $0x38] sm:$0xff]  ;;  %v159_v16 = vld [vmem:[#allocation7 + $0x48] sm:$0xff]  ;;  %v65_v17 = vld [vmem:[#allocation5 + $0x30] sm:$0xff] }
  0x2b   :  { %392 = vmatprep.subr.mxu0 %v594_v0  ;;  %427 = vmatprep.subr.mxu1 %v594_v0  ;;  %v158_v18 = vld [vmem:[#allocation7 + $0x40] sm:$0xff]  ;;  %v64_v19 = vld [vmem:[#allocation5 + $0x28] sm:$0xff]  ;;  %v157_v20 = vld [vmem:[#allocation7 + $0x38] sm:$0xff] }
  0x2c   :  { %393 = vmatpush3.msra.mxu0 %v72_v3  ;;  %428 = vmatpush3.msra.mxu1 %v646_v8  ;;  %v63_v21 = vld [vmem:[#allocation5 + $0x20] sm:$0xff]  ;;  %v156_v22 = vld [vmem:[#allocation7 + $0x30] sm:$0xff]  ;;  %v62_v23 = vld [vmem:[#allocation5 + $0x18] sm:$0xff] }
  0x2d   :  { %394 = vmatprep.subr.mxu0 %v594_v0  ;;  %429 = vmatprep.subr.mxu1 %v594_v0  ;;  %v155_v24 = vld [vmem:[#allocation7 + $0x28] sm:$0xff]  ;;  %v61_v25 = vld [vmem:[#allocation5 + $0x10] sm:$0xff]  ;;  %v154_v26 = vld [vmem:[#allocation7 + $0x20] sm:$0xff] }
  0x2e   :  { %395 = vmatpush3.msra.mxu0 %v71_v4  ;;  %430 = vmatpush3.msra.mxu1 %v651_v10  ;;  %v60_v27 = vld [vmem:[#allocation5 + $0x8] sm:$0xff]  ;;  %v153_v28 = vld [vmem:[#allocation7 + $0x18] sm:$0xff]  ;;  %v59_v29 = vld [vmem:[#allocation5] sm:$0xff] }
  0x2f   :  { %396 = vmatprep.subr.mxu0 %v594_v0  ;;  %431 = vmatprep.subr.mxu1 %v594_v0  ;;  %v57_v30 = vld [vmem:[#allocation2] sm:$0xf]  ;;  %v152_v31 = vld [vmem:[#allocation7 + $0x10] sm:$0xff]  ;;  %v151_v32 = vld [vmem:[#allocation7 + $0x8] sm:$0xff] }
  0x30   :  { %397 = vmatpush3.msra.mxu0 %v70_v6  ;;  %432 = vmatpush3.msra.mxu1 %v656_v12  ;;  %v150_v33 = vld [vmem:[#allocation7] sm:$0xff]  ;;  %v58_v37 = vld [vmem:[%s718_s3] sm:$0x7]  ;;  %s596_s3 = smov [#allocation8]  }
  0x31   :  { %398 = vmatprep.subr.mxu0 %v594_v0  ;;  %433 = vmatprep.subr.mxu1 %v594_v0  ;;  %v78_v38 = vrot.slane %v58_v37, %v77_v36  ;;  %v313_v52 = vrot.slane %v58_v37, %v312_v50  ;;  %v318_v55 = vrot.slane %v58_v37, %v317_v51  ;;  %s327_s5 = sshll.u32 %s596_s3, 4  ;;  %s328_s5 = int_to_ptr.vmem [resolvable:$true] %s327_s5 }
  0x32   :  { %399 = vmatpush3.msra.mxu0 %v69_v9  ;;  %434 = vmatpush3.msra.mxu1 %v661_v14  ;;  %s563_s6 = scalar_lea.vmem %s328_s5, 64  ;;  %p568_p2 = scmp.lt.s32.totalorder %s328_s5, %s328_s5 }
  0x33   :  { %400 = vmatprep.subr.mxu0 %v594_v0  ;;  %435 = vmatprep.subr.mxu1 %v594_v0  ;;  %p564_p1 = scmp.ne.s32.totalorder %s328_s5, %s563_s6  ;;  %p569_p3 = scmp.lt.s32.totalorder %s563_s6, %s563_s6 }
  0x34   :  { %401 = vmatpush3.msra.mxu0 %v68_v11  ;;  %436 = vmatpush3.msra.mxu1 %v159_v16 }
  0x35   :  { %402 = vmatprep.subr.mxu0 %v594_v0  ;;  %437 = vmatprep.subr.mxu1 %v594_v0  ;;  %p570_p4 = por %p569_p3, %p568_p2 }
  0x36   :  { %403 = vmatpush3.msra.mxu0 %v67_v13  ;;  %438 = vmatpush3.msra.mxu1 %v158_v18 }
  0x37   :  { %404 = vmatprep.subr.mxu0 %v594_v0  ;;  %439 = vmatprep.subr.mxu1 %v594_v0  ;;  %p571_p5 = pnand %p570_p4, %p564_p1 }
  0x38   :  { %405 = vmatpush3.msra.mxu0 %v66_v15  ;;  %440 = vmatpush3.msra.mxu1 %v157_v20 }
  0x39   :  { %406 = vmatprep.subr.mxu0 %v594_v0  ;;  %441 = vmatprep.subr.mxu1 %v594_v0 }
  0x3a   :  { %407 = vmatpush3.msra.mxu0 %v65_v17  ;;  %442 = vmatpush3.msra.mxu1 %v156_v22 }
  0x3b   :  { %408 = vmatprep.subr.mxu0 %v594_v0  ;;  %443 = vmatprep.subr.mxu1 %v594_v0 }
  0x3c   :  { %409 = vmatpush3.msra.mxu0 %v64_v19  ;;  %444 = vmatpush3.msra.mxu1 %v155_v24 }
  0x3d   :  { %410 = vmatprep.subr.mxu0 %v594_v0  ;;  %445 = vmatprep.subr.mxu1 %v594_v0 }
  0x3e   :  { %411 = vmatpush3.msra.mxu0 %v63_v21  ;;  %446 = vmatpush3.msra.mxu1 %v154_v26 }
  0x3f   :  { %412 = vmatprep.subr.mxu0 %v594_v0  ;;  %447 = vmatprep.subr.mxu1 %v594_v0 }
  0x40   :  { %413 = vmatpush3.msra.mxu0 %v62_v23  ;;  %448 = vmatpush3.msra.mxu1 %v153_v28 }
  0x41   :  { %414 = vmatprep.subr.mxu0 %v594_v0  ;;  %449 = vmatprep.subr.mxu1 %v594_v0 }
  0x42   :  { %415 = vmatpush3.msra.mxu0 %v61_v25  ;;  %450 = vmatpush3.msra.mxu1 %v152_v31 }
  0x43   :  { %416 = vmatprep.subr.mxu0 %v594_v0  ;;  %451 = vmatprep.subr.mxu1 %v594_v0 }
  0x44   :  { %417 = vmatpush3.msra.mxu0 %v60_v27  ;;  %452 = vmatpush3.msra.mxu1 %v151_v32 }
  0x45   :  { %418 = vmatprep.subr.mxu0 %v594_v0  ;;  %453 = vmatprep.subr.mxu1 %v594_v0 }
  0x46   :  { %419 = vmatpush3.msra.mxu0 %v59_v29  ;;  %454 = vmatpush3.msra.mxu1 %v150_v33 }
  0x47   :  { %421 = vmatmul.mubr.f32.vlgmr.msra.gmra.mxu0 %v57_v30  ;;  %458 = vmatprep.subr.mxu0 %v594_v0 }
  0x48   :  { %459 = vmatpush3.msra.mxu0 %v639_v5  ;;  %490 = vmatprep.mubr.msk.f32.mxu0 %vm595_vm0, %v594_v0 }
  0x49   :  { %460 = vmatprep.subr.mxu0 %v594_v0 }
  0x4a   :  { %461 = vmatpush3.msra.mxu0 %v643_v7 }
  0x4b   :  { %462 = vmatprep.subr.mxu0 %v594_v0 }
  0x4c   :  { %463 = vmatpush3.msra.mxu0 %v646_v8 }
  0x4d   :  { %464 = vmatprep.subr.mxu0 %v594_v0 }
  0x4e   :  { %465 = vmatpush3.msra.mxu0 %v651_v10 }
  0x4f   :  { %466 = vmatprep.subr.mxu0 %v594_v0 }
  0x50   :  { %467 = vmatpush3.msra.mxu0 %v656_v12 }
  0x51   :  { %468 = vmatprep.subr.mxu0 %v594_v0 }
  0x52   :  { %469 = vmatpush3.msra.mxu0 %v661_v14 }
  0x53   :  { %470 = vmatprep.subr.mxu0 %v594_v0 }
  0x54   :  { %471 = vmatpush3.msra.mxu0 %v159_v16 }
  0x55   :  { %472 = vmatprep.subr.mxu0 %v594_v0 }
  0x56   :  { %473 = vmatpush3.msra.mxu0 %v158_v18 }
  0x57   :  { %474 = vmatprep.subr.mxu0 %v594_v0 }
  0x58   :  { %475 = vmatpush3.msra.mxu0 %v157_v20 }
  0x59   :  { %476 = vmatprep.subr.mxu0 %v594_v0 }
  0x5a   :  { %477 = vmatpush3.msra.mxu0 %v156_v22 }
  0x5b   :  { %478 = vmatprep.subr.mxu0 %v594_v0 }
  0x5c   :  { %479 = vmatpush3.msra.mxu0 %v155_v24 }
  0x5d   :  { %480 = vmatprep.subr.mxu0 %v594_v0 }
  0x5e   :  { %481 = vmatpush3.msra.mxu0 %v154_v26 }
  0x5f   :  { %482 = vmatprep.subr.mxu0 %v594_v0 }
  0x60   :  { %483 = vmatpush3.msra.mxu0 %v153_v28 }
  0x61   :  { %484 = vmatprep.subr.mxu0 %v594_v0 }
  0x62   :  { %485 = vmatpush3.msra.mxu0 %v152_v31 }
  0x63   :  { %486 = vmatprep.subr.mxu0 %v594_v0 }
  0x64   :  { %487 = vmatpush3.msra.mxu0 %v151_v32 }
  0x65   :  { %488 = vmatprep.subr.mxu0 %v594_v0 }
  0x66   :  { %489 = vmatpush3.msra.mxu0 %v150_v33 }
 0x107   :  { %v145_v39 = vpop.f32.mrf.mxu0 }
 0x108   :  { %v146_v40 = vadd.f32 %v145_v39, %v78_v38 }
 0x109   :  { %v422_v41 = vpop.f32.mrf.mxu0 }
 0x10a   :  { %v149_v42 = vadd.f32 %v146_v40, %v57_v30 }
 0x10c   :  { %456 = vmatmul.mubr.f32.vlgmr.msra.gmra.mxu1 %v149_v42 }
 0x1cc   :  { %v232_v43 = vpop.f32.mrf.mxu1 }
 0x1cd   :  { %v236_v44 = vsub.f32 %v149_v42, %v232_v43 }
 0x1ce   :  { %v457_v45 = vpop.f32.mrf.mxu1 }
 0x1cf   :  { %v237_v46 = vmul.f32 %v236_v44, %v236_v44 }
 0x1d1   :  { %491 = vmatmul.mubr.f32.vlgmr.msra.gmra.mxu0 %v237_v46 }
 0x291   :  { %v304_v47 = vpop.f32.mrf.mxu0 }
 0x292   :  { %v305_v48 = vadd.f32 1e-05, %v304_v47 }
 0x293   :  { %v492_v49 = vpop.f32.mrf.mxu0 }
 0x294   :  { %501 = vrsqrt.f32 %v305_v48 }
 0x2a1   :  { %v502_v53 = vpop.eup %501 }
 0x2a2   :  { %v309_v54 = vmul.f32 %v502_v53, %v236_v44 }
 0x2a4   :  { %v314_v56 = vmul.f32 %v313_v52, %v309_v54 }
 0x2a6   :  { %v319_v57 = vadd.f32 %v318_v55, %v314_v56 }
 0x2a8   :  { %320 = vst [vmem:[#allocation8] sm:$0xf] %v319_v57 }
 0x2a9   :  { %574 = shalt.err (!%p571_p5)
}
 0x2aa   :  { %330 = dma.vmem_to_hbm [thread:$0]  %s328_s5, 64, %s719_s4, [#allocation4]  }
 0x2ab   :  { %587 = dma.done.wait [#allocation4], 64  }
 0x2ac   :  { %588 = vsyncadd [#allocation4], 4294967232 }
 0x2ad   :  { %334 = vsyncpa [#allocation3], 1 }
 0x2ae   :  { %335 = vsyncpa [#allocation6], 1 }
 0x2af   :  { %336 = vsyncpa [#allocation4], 1 }

</bundles_post_ra>
